<compile_context>
chip_gen: v6e
topology: v6e:2x2x1
jax: 0.10.0
libtpu: 0.0.40
codegen_flags: <defaults>
</compile_context>

<pallas_src>
import functools

import jax
import jax.numpy as jnp
from jax.experimental import pallas as pl
from jax.experimental.pallas import tpu as pltpu


def _round_up(a: int, b: int) -> int:
    return (a + b - 1) // b * b


def _linear_kernel(x_ref, w_ref, b_ref, o_ref, acc_ref):
    """One (tm, tn) output tile, accumulated over the K grid axis.

    x_ref: (tm, tk)   w_ref: (tk, tn)   b_ref: (1, tn)
    o_ref: (tm, tn)   acc_ref: (tm, tn) f32 scratch accumulator
    """
    k = pl.program_id(2)

    @pl.when(k == 0)
    def _():
        acc_ref[...] = jnp.zeros_like(acc_ref)

    acc_ref[...] += jnp.dot(
        x_ref[...], w_ref[...], preferred_element_type=jnp.float32
    )

    @pl.when(k == pl.num_programs(2) - 1)
    def _():
        # Bias is added exactly once per output tile (zeros when unused).
        o_ref[...] = (acc_ref[...] + b_ref[...]).astype(o_ref.dtype)


@functools.partial(jax.jit, static_argnames=("use_bias",))
def linear_forward(x, weights, bias=None, *, use_bias=False):
    """y = x @ weights (+ bias). x: (..., ins), weights: (ins, outs)."""
    ins, outs = weights.shape
    lead_shape = x.shape[:-1]
    m = 1
    for d in lead_shape:
        m *= d
    x2d = x.reshape(m, ins)

    # ---- tile sizes (MXU / lane friendly, clamped for small problems) ----
    tm = min(256, _round_up(m, 8))       # sublane granule: multiple of 8
    tn = min(256, _round_up(outs, 128))  # lane granule:    multiple of 128
    tk = min(512, _round_up(ins, 128))   # lane granule:    multiple of 128

    mp = _round_up(m, tm)
    kp = _round_up(ins, tk)
    np_ = _round_up(outs, tn)

    # ---- pad operands so every block is full (zero-padding K is exact) ----
    if (mp, kp) != (m, ins):
        x2d = jnp.pad(x2d, ((0, mp - m), (0, kp - ins)))
    if (kp, np_) != (ins, outs):
        w = jnp.pad(weights, ((0, kp - ins), (0, np_ - outs)))
    else:
        w = weights

    if use_bias:
        b = bias.astype(jnp.float32)
    else:
        b = jnp.zeros((outs,), jnp.float32)
    if np_ != outs:
        b = jnp.pad(b, (0, np_ - outs))
    b2d = b.reshape(1, np_)

    grid = (mp // tm, np_ // tn, kp // tk)

    # ---- VMEM budget (double-buffered inputs/outputs + f32 accumulator) ----
    itemsize = x2d.dtype.itemsize
    vmem_needed = (
        2 * (tm * tk + tk * tn) * itemsize   # x, w double-buffered tiles
        + 2 * tm * tn * itemsize             # output double-buffered tiles
        + tm * tn * 4                        # f32 accumulator scratch
        + 2 * tn * 4                         # bias tiles
    )
    # Headroom, but capped so the config stays safe on v7x (64 MiB physical).
    vmem_limit = min(max(2 * vmem_needed, 16 * 1024 * 1024), 48 * 1024 * 1024)

    cost = pl.CostEstimate(
        flops=2 * mp * kp * np_,
        transcendentals=0,
        bytes_accessed=(
            mp * kp * itemsize + kp * np_ * itemsize + mp * np_ * itemsize
        ),
    )

    y2d = pl.pallas_call(
        _linear_kernel,
        out_shape=jax.ShapeDtypeStruct((mp, np_), x.dtype),
        grid_spec=pltpu.PrefetchScalarGridSpec(
            num_scalar_prefetch=0,
            grid=grid,
            in_specs=[
                pl.BlockSpec((tm, tk), lambda i, j, k: (i, k)),
                pl.BlockSpec((tk, tn), lambda i, j, k: (k, j)),
                pl.BlockSpec((1, tn), lambda i, j, k: (0, j)),
            ],
            out_specs=pl.BlockSpec((tm, tn), lambda i, j, k: (i, j)),
            scratch_shapes=[pltpu.VMEM((tm, tn), jnp.float32)],
        ),
        compiler_params=pltpu.CompilerParams(
            dimension_semantics=("parallel", "parallel", "arbitrary"),
            vmem_limit_bytes=vmem_limit,
        ),
        cost_estimate=cost,
    )(x2d, w, b2d)

    # Drop padding and restore leading dims.
    y2d = y2d[:m, :outs]
    return y2d.reshape(*lead_shape, outs)


if __name__ == "__main__":
    # Deterministic parameter init matching the PyTorch module's __init__:
    #   weights ~ (U[0,1) - 0.5) * 0.05, shape [ins, outs]
    #   bias    ~ (U[0,1) - 0.5) * 0.05, shape [outs]        (when use_bias)
    key = jax.random.PRNGKey(0)
    k_x, k_w, k_b = jax.random.split(key, 3)

    batch, seq, ins, outs = 2, 8, 32, 32

    x = jax.random.normal(k_x, (batch, seq, ins), dtype=jnp.float32)
    weights = (jax.random.uniform(k_w, (ins, outs), dtype=jnp.float32) - 0.5) * 0.05
    bias = (jax.random.uniform(k_b, (outs,), dtype=jnp.float32) - 0.5) * 0.05

    # Without bias (default use_bias=False in the module)
    y_nobias = linear_forward(x, weights, use_bias=False)
    jax.block_until_ready(y_nobias)

    # With bias
    y_bias = linear_forward(x, weights, bias, use_bias=True)
    jax.block_until_ready(y_bias)

    # Correctness check vs plain-JAX reference
    ref_nobias = jnp.matmul(x, weights)
    ref_bias = ref_nobias + bias
    assert y_nobias.shape == ref_nobias.shape
    assert y_bias.shape == ref_bias.shape
    assert jnp.allclose(y_nobias, ref_nobias, atol=1e-5, rtol=1e-5)
    assert jnp.allclose(y_bias, ref_bias, atol=1e-5, rtol=1e-5)

    # Also exercise a larger, tile-crossing shape to validate the K/M/N grid.
    k_x2 = jax.random.fold_in(k_x, 1)
    k_w2 = jax.random.fold_in(k_w, 1)
    x_big = jax.random.normal(k_x2, (4, 300, 640), dtype=jnp.float32)
    w_big = (jax.random.uniform(k_w2, (640, 384), dtype=jnp.float32) - 0.5) * 0.05
    y_big = linear_forward(x_big, w_big, bias=None, use_bias=False)
    jax.block_until_ready(y_big)
    ref_big = jnp.matmul(x_big, w_big)
    assert jnp.allclose(y_big, ref_big, atol=1e-4, rtol=1e-4)

    print("KERNEL_OK")
</pallas_src>

<mosaic_0001>
module attributes {stable_mosaic.version = 11 : i64} {
  func.func @_linear_kernel(%arg0: i32, %arg1: i32, %arg2: i32, %arg3: memref<16x128xf32, #tpu.memory_space<vmem>>, %arg4: memref<128x128xf32, #tpu.memory_space<vmem>>, %arg5: memref<1x128xf32, #tpu.memory_space<vmem>>, %arg6: memref<16x128xf32, #tpu.memory_space<vmem>>, %arg7: memref<16x128xf32, #tpu.memory_space<vmem>>) attributes {dimension_semantics = [#tpu.dimension_semantics<parallel>, #tpu.dimension_semantics<parallel>, #tpu.dimension_semantics<arbitrary>], iteration_bounds = array<i64: 1, 1, 1>, scalar_prefetch = 0 : i64, scratch_operands = 1 : i64, tpu.core_type = #tpu.core_type<tc>, window_params = [{transform_indices = @transform_0, window_bounds = array<i64: 16, 128>}, {transform_indices = @transform_1, window_bounds = array<i64: 128, 128>}, {transform_indices = @transform_2, window_bounds = array<i64: 1, 128>}, {transform_indices = @transform_3, window_bounds = array<i64: 16, 128>}]} {
    %c0_i32 = arith.constant 0 : i32
    %0 = arith.cmpi eq, %arg2, %c0_i32 : i32
    %1 = arith.extui %0 : i1 to i32
    %c0_i32_0 = arith.constant 0 : i32
    %2 = arith.cmpi ne, %1, %c0_i32_0 : i32
    scf.if %2 {
      %cst_10 = arith.constant 0.000000e+00 : f32
      %12 = vector.broadcast %cst_10 : f32 to vector<16x128xf32>
      %c0_11 = arith.constant 0 : index
      %c0_12 = arith.constant 0 : index
      %13 = vector.load %arg7[%c0_11, %c0_12] : memref<16x128xf32, #tpu.memory_space<vmem>>, vector<16x128xf32>
      tpu.vector_store %arg7[%c0_11, %c0_12], %12 {strides = array<i32>} : memref<16x128xf32, #tpu.memory_space<vmem>>, vector<16x128xf32>,
    } else {
    }
    %c0 = arith.constant 0 : index
    %c0_1 = arith.constant 0 : index
    %3 = vector.load %arg7[%c0, %c0_1] : memref<16x128xf32, #tpu.memory_space<vmem>>, vector<16x128xf32>
    %c0_2 = arith.constant 0 : index
    %c0_3 = arith.constant 0 : index
    %4 = vector.load %arg3[%c0_2, %c0_3] : memref<16x128xf32, #tpu.memory_space<vmem>>, vector<16x128xf32>
    %c0_4 = arith.constant 0 : index
    %c0_5 = arith.constant 0 : index
    %5 = vector.load %arg4[%c0_4, %c0_5] : memref<128x128xf32, #tpu.memory_space<vmem>>, vector<128x128xf32>
    %cst = arith.constant dense<0.000000e+00> : vector<16x128xf32>
    %6 = tpu.matmul %4, %5, %cst {dimension_numbers = #tpu.dot_dimension_numbers<[1], [0], [0], [1], [0, 0, 1, 1], [], []>} : vector<16x128xf32>, vector<128x128xf32>, vector<16x128xf32> -> vector<16x128xf32>
    %7 = arith.addf %3, %6 : vector<16x128xf32>
    %c0_6 = arith.constant 0 : index
    %c0_7 = arith.constant 0 : index
    %8 = vector.load %arg7[%c0_6, %c0_7] : memref<16x128xf32, #tpu.memory_space<vmem>>, vector<16x128xf32>
    tpu.vector_store %arg7[%c0_6, %c0_7], %7 {strides = array<i32>} : memref<16x128xf32, #tpu.memory_space<vmem>>, vector<16x128xf32>,
    %c0_i32_8 = arith.constant 0 : i32
    %9 = arith.cmpi eq, %arg2, %c0_i32_8 : i32
    %10 = arith.extui %9 : i1 to i32
    %c0_i32_9 = arith.constant 0 : i32
    %11 = arith.cmpi ne, %10, %c0_i32_9 : i32
    scf.if %11 {
      %c0_10 = arith.constant 0 : index
      %c0_11 = arith.constant 0 : index
      %12 = vector.load %arg7[%c0_10, %c0_11] : memref<16x128xf32, #tpu.memory_space<vmem>>, vector<16x128xf32>
      %c0_12 = arith.constant 0 : index
      %c0_13 = arith.constant 0 : index
      %13 = vector.load %arg5[%c0_12, %c0_13] : memref<1x128xf32, #tpu.memory_space<vmem>>, vector<1x128xf32>
      %14 = vector.broadcast %13 : vector<1x128xf32> to vector<16x128xf32>
      %15 = arith.addf %12, %14 : vector<16x128xf32>
      %c0_14 = arith.constant 0 : index
      %c0_15 = arith.constant 0 : index
      %16 = vector.load %arg6[%c0_14, %c0_15] : memref<16x128xf32, #tpu.memory_space<vmem>>, vector<16x128xf32>
      tpu.vector_store %arg6[%c0_14, %c0_15], %15 {strides = array<i32>} : memref<16x128xf32, #tpu.memory_space<vmem>>, vector<16x128xf32>,
    } else {
    }
    return
  }
  func.func @transform_0(%arg0: i32, %arg1: i32, %arg2: i32) -> (i32, i32) {
    %c0_i32 = arith.constant 0 : i32
    return %arg0, %arg2 : i32, i32
  }
  func.func @transform_1(%arg0: i32, %arg1: i32, %arg2: i32) -> (i32, i32) {
    %c0_i32 = arith.constant 0 : i32
    return %arg2, %arg1 : i32, i32
  }
  func.func @transform_2(%arg0: i32, %arg1: i32, %arg2: i32) -> (i32, i32) {
    %c0_i32 = arith.constant 0 : i32
    %c0_i32_0 = arith.constant 0 : i32
    return %c0_i32, %arg1 : i32, i32
  }
  func.func @transform_3(%arg0: i32, %arg1: i32, %arg2: i32) -> (i32, i32) {
    %c0_i32 = arith.constant 0 : i32
    return %arg0, %arg1 : i32, i32
  }
}

</mosaic_0001>

<bundles_post_ra>
// kernel: linear_forward.1
= control target key start
LH: loop header
LB: loop body
LE: loop exit
PB: predicated region body
PF: predicated region fallthrough
CT: control target
= control target key end

     0   :  { %s276_s1 = inlined_call_operand.vmem [shape: f32[128,128], index: 1, kind: input, shape index: {}]   ;;  %s277_s0 = inlined_call_operand.vmem [shape: f32[16,128], index: 0, kind: input, shape index: {}]   ;;  %s278_s2 = inlined_call_operand.vmem [shape: f32[1,128], index: 2, kind: input, shape index: {}]   ;;  %s279_s3 = inlined_call_operand.vmem [shape: f32[16,128], index: 3, kind: output, shape index: {}]  }
   0x1   :  { %v39_v0 = vld [vmem:[%s276_s1 + $0x78] sm:$0xff]  ;;  %v38_v1 = vld [vmem:[%s276_s1 + $0x70] sm:$0xff]  ;;  %v37_v2 = vld [vmem:[%s276_s1 + $0x68] sm:$0xff] }
   0x2   :  { %158 = vmatprep.subr.mxu0 %v39_v0  ;;  %v36_v3 = vld [vmem:[%s276_s1 + $0x60] sm:$0xff]  ;;  %v35_v5 = vld [vmem:[%s276_s1 + $0x58] sm:$0xff]  ;;  %v34_v6 = vld [vmem:[%s276_s1 + $0x50] sm:$0xff] }
   0x3   :  { %159 = vmatpush3.msra.mxu0 %v39_v0  ;;  %v22_v4 = vld [vmem:[%s277_s0] sm:$0xff]  ;;  %v33_v7 = vld [vmem:[%s276_s1 + $0x48] sm:$0xff]  ;;  %v31_v9 = vld [vmem:[%s276_s1 + $0x38] sm:$0xff] }
   0x4   :  { %160 = vmatprep.subr.mxu0 %v38_v1  ;;  %190 = vmatprep.mubr.f32.mxu0 %v22_v4  ;;  %v32_v8 = vld [vmem:[%s276_s1 + $0x40] sm:$0xff]  ;;  %v30_v10 = vld [vmem:[%s276_s1 + $0x30] sm:$0xff]  ;;  %v29_v11 = vld [vmem:[%s276_s1 + $0x28] sm:$0xff] }
   0x5   :  { %161 = vmatpush3.msra.mxu0 %v38_v1  ;;  %v28_v12 = vld [vmem:[%s276_s1 + $0x20] sm:$0xff]  ;;  %v27_v13 = vld [vmem:[%s276_s1 + $0x18] sm:$0xff]  ;;  %v26_v14 = vld [vmem:[%s276_s1 + $0x10] sm:$0xff] }
   0x6   :  { %162 = vmatprep.subr.mxu0 %v37_v2  ;;  %v25_v15 = vld [vmem:[%s276_s1 + $0x8] sm:$0xff]  ;;  %v24_v16 = vld [vmem:[%s276_s1] sm:$0xff] }
   0x7   :  { %163 = vmatpush3.msra.mxu0 %v37_v2  ;;  %v23_v17 = vld [vmem:[%s277_s0 + $0x8] sm:$0xff]  ;;  %v139_v18 = vld [vmem:[%s278_s2] ss:$0 sm:$0xff] }
   0x8   :  { %164 = vmatprep.subr.mxu0 %v36_v3 }
   0x9   :  { %165 = vmatpush3.msra.mxu0 %v36_v3 }
   0xa   :  { %166 = vmatprep.subr.mxu0 %v35_v5 }
   0xb   :  { %167 = vmatpush3.msra.mxu0 %v35_v5 }
   0xc   :  { %168 = vmatprep.subr.mxu0 %v34_v6 }
   0xd   :  { %169 = vmatpush3.msra.mxu0 %v34_v6 }
   0xe   :  { %170 = vmatprep.subr.mxu0 %v33_v7 }
   0xf   :  { %171 = vmatpush3.msra.mxu0 %v33_v7 }
  0x10   :  { %172 = vmatprep.subr.mxu0 %v32_v8 }
  0x11   :  { %173 = vmatpush3.msra.mxu0 %v32_v8 }
  0x12   :  { %174 = vmatprep.subr.mxu0 %v31_v9 }
  0x13   :  { %175 = vmatpush3.msra.mxu0 %v31_v9 }
  0x14   :  { %176 = vmatprep.subr.mxu0 %v30_v10 }
  0x15   :  { %177 = vmatpush3.msra.mxu0 %v30_v10 }
  0x16   :  { %178 = vmatprep.subr.mxu0 %v29_v11 }
  0x17   :  { %179 = vmatpush3.msra.mxu0 %v29_v11 }
  0x18   :  { %180 = vmatprep.subr.mxu0 %v28_v12 }
  0x19   :  { %181 = vmatpush3.msra.mxu0 %v28_v12 }
  0x1a   :  { %182 = vmatprep.subr.mxu0 %v27_v13 }
  0x1b   :  { %183 = vmatpush3.msra.mxu0 %v27_v13 }
  0x1c   :  { %184 = vmatprep.subr.mxu0 %v26_v14 }
  0x1d   :  { %185 = vmatpush3.msra.mxu0 %v26_v14 }
  0x1e   :  { %186 = vmatprep.subr.mxu0 %v25_v15 }
  0x1f   :  { %187 = vmatpush3.msra.mxu0 %v25_v15 }
  0x20   :  { %188 = vmatprep.subr.mxu0 %v24_v16 }
  0x21   :  { %189 = vmatpush3.msra.mxu0 %v24_v16 }
  0x22   :  { %191 = vmatmul.mubr.f32.vlgmr.msra.gmra.mxu0 %v23_v17 }
  0xe2   :  { %v192_v19 = vpop.f32.mrf.mxu0 }
  0xe3   :  { %v132_v20 = vadd.f32 %v192_v19, %v139_v18 }
  0xe4   :  { %v106_v21 = vpop.f32.mrf.mxu0 }
  0xe5   :  { %134 = vst [vmem:[%s279_s3 + $0x8] sm:$0xff] %v132_v20  ;;  %v131_v22 = vadd.f32 %v139_v18, %v106_v21 }
  0xe7   :  { %133 = vst [vmem:[%s279_s3] sm:$0xff] %v131_v22 }

</bundles_post_ra>
